<compile_context>
chip_gen: v6e
topology: v6e:2x2x1
jax: 0.10.0
libtpu: 0.0.40
codegen_flags: <defaults>
</compile_context>

<pallas_src>
import numpy as np
import jax
import jax.numpy as jnp
from jax.experimental import pallas as pl
from jax.experimental.pallas import tpu as pltpu


# ----------------------------------------------------------------------------
# Glue helpers (plain JAX)
# ----------------------------------------------------------------------------
def _interp_matrix(out_size: int, in_size: int) -> jnp.ndarray:
    """Row-interpolation matrix for bilinear upsampling, align_corners=True."""
    if in_size == 1:
        return jnp.ones((out_size, 1), jnp.float32)
    if out_size == 1:
        return jnp.zeros((1, in_size), jnp.float32).at[0, 0].set(1.0)
    pos = jnp.arange(out_size, dtype=jnp.float32) * (in_size - 1) / (out_size - 1)
    lo = jnp.clip(jnp.floor(pos).astype(jnp.int32), 0, in_size - 2)
    frac = pos - lo.astype(jnp.float32)
    rows = jnp.arange(out_size)
    mat = jnp.zeros((out_size, in_size), jnp.float32)
    mat = mat.at[rows, lo].add(1.0 - frac)
    mat = mat.at[rows, lo + 1].add(frac)
    return mat


def make_params(key: jax.Array, channels: int) -> jnp.ndarray:
    """Deterministically build fused (conv + eval-BN) per-channel params.

    Returns (C, 8) f32: columns [s1, t1, s2, t2, s3, t3, 0, 0] where each
    stage computes relu(x * s + t).
    """
    eps = 1e-5
    keys = jax.random.split(key, 12)
    cols = []
    for i in range(3):
        w = jax.random.uniform(keys[4 * i + 0], (channels,), minval=-1.0, maxval=1.0)
        b = jax.random.uniform(keys[4 * i + 1], (channels,), minval=-0.5, maxval=0.5)
        gamma = 1.0 + 0.1 * jax.random.normal(keys[4 * i + 2], (channels,))
        beta = 0.1 * jax.random.normal(keys[4 * i + 3], (channels,))
        run_mean = jnp.zeros((channels,), jnp.float32)
        run_var = jnp.ones((channels,), jnp.float32)
        inv = gamma / jnp.sqrt(run_var + eps)
        cols.append(w * inv)                       # s_i
        cols.append((b - run_mean) * inv + beta)   # t_i
    params = jnp.stack(cols, axis=1)               # (C, 6)
    params = jnp.pad(params, ((0, 0), (0, 2)))     # (C, 8)
    return params.astype(jnp.float32)


def _pick_channel_tile(B: int, C: int, H: int, W: int,
                       bytes_per_elem: int = 4,
                       budget_bytes: int = 8 << 20) -> int:
    """Pick the channel tile Ct (a divisor of C).

    Per grid step, the double-buffered residual-in + out tiles dominate VMEM:
    roughly 2 * 2 * Ct * H * W * bytes_per_elem.  An 8 MiB budget keeps the
    kernel inside the default scoped-VMEM limit on v5e/v6e/v7x; raise
    budget_bytes together with CompilerParams(vmem_limit_bytes=...) for
    production-sized feature maps on v6e/v5e (128 MiB physical VMEM).
    """
    max_ct = max(1, budget_bytes // (4 * H * W * bytes_per_elem))
    divisors = [d for d in range(1, C + 1) if C % d == 0]
    cands = [d for d in divisors if d <= max_ct] or [1]
    ct = max(cands)
    # v7x has 2 TensorCores; keep >= 2 grid steps so work shards across both.
    if B * (C // ct) < 2:
        smaller = [d for d in cands if d < ct]
        if smaller:
            ct = max(smaller)
    return ct


# ----------------------------------------------------------------------------
# Pallas kernel
# ----------------------------------------------------------------------------
def _local_atten_kernel(params_ref, xsub_ref, xres_ref, wkt_ref, o_ref):
    # Per-channel fused conv+BN params, vectorized over the channel tile.
    p = params_ref[0]                         # (Ct, 8) f32
    s1, t1 = p[:, 0:1], p[:, 1:2]
    s2, t2 = p[:, 2:3], p[:, 3:4]
    s3, t3 = p[:, 4:5], p[:, 5:6]

    # Three fused [dwconv1x1(stride2) + BN + ReLU] stages on the stride-8
    # subsample of x, all channels of the tile at once.
    xs = xsub_ref[0, 0].astype(jnp.float32)   # (Ct, h3*w3)
    y = jnp.maximum(xs * s1 + t1, 0.0)
    y = jnp.maximum(y * s2 + t2, 0.0)
    y = jnp.maximum(y * s3 + t3, 0.0)

    # Bilinear upsample (align_corners=True) as ONE batched, lane-dense MXU
    # matmul: (Ct, h3*w3) @ (h3*w3, H*W) -> (Ct, H*W).
    up = jnp.dot(y, wkt_ref[...], preferred_element_type=jnp.float32)

    # sigmoid(up) = 1 / (1 + exp(-up)); up >= 0 (ReLU outputs, non-negative
    # interpolation weights) so this is numerically safe.  approx=True would
    # move the divide onto the EUP at ~1e-3 accuracy cost.
    mask = pl.reciprocal(1.0 + jnp.exp(-up), approx=False)

    # out = x + x * mask == x * (1 + mask), on the lane-dense flat layout.
    res = xres_ref[0, 0].astype(jnp.float32)  # (Ct, H*W)
    o_ref[0, 0] = (res * (1.0 + mask)).astype(o_ref.dtype)


def local_atten_forward(x: jnp.ndarray, params: jnp.ndarray) -> jnp.ndarray:
    """Pallas forward of LocalAttenModule.  x: (B, C, H, W) NCHW."""
    B, C, H, W = x.shape

    # Spatial size after three stride-2, kernel-1, no-pad convs == ceil(/8).
    h3, w3 = -(-H // 8), -(-W // 8)

    Ct = _pick_channel_tile(B, C, H, W, bytes_per_elem=x.dtype.itemsize)
    G = C // Ct

    # Lane-dense layouts (free reshapes of contiguous NCHW):
    #   residual/out : (B, G, Ct, H*W)  -> last dim is a multiple of 128 for
    #                                      typical feature maps (256 here).
    #   subsample    : (B, G, Ct, h3*w3) tiny (1/64 of x); gathered wrapper-
    #                  side to avoid an in-kernel relayout of the flat block.
    x_res = x.reshape(B, G, Ct, H * W)
    x_sub = x[:, :, ::8, ::8].reshape(B, G, Ct, h3 * w3)
    params_g = params.astype(jnp.float32).reshape(G, Ct, 8)

    # Full upsample operator: kron(Wh, Ww)^T, shape (h3*w3, H*W).
    wh = _interp_matrix(H, h3)                # (H, h3)
    ww = _interp_matrix(W, w3)                # (W, w3)
    wkt = jnp.kron(wh, ww).T                  # (h3*w3, H*W)

    out = pl.pallas_call(
        _local_atten_kernel,
        out_shape=jax.ShapeDtypeStruct((B, G, Ct, H * W), x.dtype),
        grid=(B, G),
        in_specs=[
            pl.BlockSpec((1, Ct, 8), lambda b, g: (g, 0, 0)),            # params
            pl.BlockSpec((1, 1, Ct, h3 * w3), lambda b, g: (b, g, 0, 0)),  # x_sub
            pl.BlockSpec((1, 1, Ct, H * W), lambda b, g: (b, g, 0, 0)),    # residual
            pl.BlockSpec((h3 * w3, H * W), lambda b, g: (0, 0)),           # kron(Wh,Ww)^T
        ],
        out_specs=pl.BlockSpec((1, 1, Ct, H * W), lambda b, g: (b, g, 0, 0)),
        compiler_params=pltpu.CompilerParams(
            dimension_semantics=("parallel", "parallel")
        ),
    )(params_g, x_sub, x_res, wkt)

    return out.reshape(B, C, H, W)


# ----------------------------------------------------------------------------
# Pure-JAX reference (same math, no Pallas) for a sanity check
# ----------------------------------------------------------------------------
def local_atten_reference(x: jnp.ndarray, params: jnp.ndarray) -> jnp.ndarray:
    B, C, H, W = x.shape
    y = x[:, :, ::8, ::8].astype(jnp.float32)
    for i in range(3):
        s = params[:, 2 * i][None, :, None, None]
        t = params[:, 2 * i + 1][None, :, None, None]
        y = jnp.maximum(y * s + t, 0.0)
    wh = _interp_matrix(H, y.shape[2])
    ww = _interp_matrix(W, y.shape[3])
    up = jnp.einsum("hp,bcpq,wq->bchw", wh, y, ww)
    mask = jax.nn.sigmoid(up)
    return (x + x * mask).astype(x.dtype)


# ----------------------------------------------------------------------------
if __name__ == "__main__":
    key = jax.random.PRNGKey(0)
    kx, kp = jax.random.split(key)

    B, C, H, W = 2, 4, 16, 16
    x = jax.random.normal(kx, (B, C, H, W), dtype=jnp.float32)
    params = make_params(kp, C)

    out = local_atten_forward(x, params)
    out = jax.block_until_ready(out)

    ref = jax.block_until_ready(local_atten_reference(x, params))
    np.testing.assert_allclose(np.asarray(out), np.asarray(ref), rtol=1e-5, atol=1e-5)

    print("KERNEL_OK")
</pallas_src>

<mosaic_0001>
module attributes {stable_mosaic.version = 11 : i64} {
  func.func @_local_atten_kernel(%arg0: i32, %arg1: i32, %arg2: memref<1x4x8xf32, #tpu.memory_space<vmem>>, %arg3: memref<1x1x4x4xf32, #tpu.memory_space<vmem>>, %arg4: memref<1x1x4x256xf32, #tpu.memory_space<vmem>>, %arg5: memref<4x256xf32, #tpu.memory_space<vmem>>, %arg6: memref<1x1x4x256xf32, #tpu.memory_space<vmem>>) attributes {dimension_semantics = [#tpu.dimension_semantics<parallel>, #tpu.dimension_semantics<parallel>], iteration_bounds = array<i64: 2, 1>, scalar_prefetch = 0 : i64, scratch_operands = 0 : i64, tpu.core_type = #tpu.core_type<tc>, window_params = [{transform_indices = @transform_0, window_bounds = array<i64: 1, 4, 8>}, {transform_indices = @transform_1, window_bounds = array<i64: 1, 1, 4, 4>}, {transform_indices = @transform_2, window_bounds = array<i64: 1, 1, 4, 256>}, {pipeline_mode = #tpu.pipeline_mode<synchronous>, transform_indices = @transform_3, window_bounds = array<i64: 4, 256>}, {transform_indices = @transform_4, window_bounds = array<i64: 1, 1, 4, 256>}]} {
    %c0 = arith.constant 0 : index
    %c0_0 = arith.constant 0 : index
    %c0_1 = arith.constant 0 : index
    %0 = vector.load %arg2[%c0, %c0_0, %c0_1] : memref<1x4x8xf32, #tpu.memory_space<vmem>>, vector<1x4x8xf32>
    %1 = vector.shape_cast %0 : vector<1x4x8xf32> to vector<4x8xf32>
    %2 = vector.extract_strided_slice %1 {offsets = [0, 0], sizes = [4, 1], strides = [1, 1]} : vector<4x8xf32> to vector<4x1xf32>
    %3 = vector.extract_strided_slice %1 {offsets = [0, 1], sizes = [4, 1], strides = [1, 1]} : vector<4x8xf32> to vector<4x1xf32>
    %4 = vector.extract_strided_slice %1 {offsets = [0, 2], sizes = [4, 1], strides = [1, 1]} : vector<4x8xf32> to vector<4x1xf32>
    %5 = vector.extract_strided_slice %1 {offsets = [0, 3], sizes = [4, 1], strides = [1, 1]} : vector<4x8xf32> to vector<4x1xf32>
    %6 = vector.extract_strided_slice %1 {offsets = [0, 4], sizes = [4, 1], strides = [1, 1]} : vector<4x8xf32> to vector<4x1xf32>
    %7 = vector.extract_strided_slice %1 {offsets = [0, 5], sizes = [4, 1], strides = [1, 1]} : vector<4x8xf32> to vector<4x1xf32>
    %c0_2 = arith.constant 0 : index
    %c0_3 = arith.constant 0 : index
    %c0_4 = arith.constant 0 : index
    %c0_5 = arith.constant 0 : index
    %8 = vector.load %arg3[%c0_2, %c0_3, %c0_4, %c0_5] : memref<1x1x4x4xf32, #tpu.memory_space<vmem>>, vector<1x1x4x4xf32>
    %9 = vector.shape_cast %8 : vector<1x1x4x4xf32> to vector<4x4xf32>
    %10 = vector.broadcast %2 : vector<4x1xf32> to vector<4x4xf32>
    %11 = arith.mulf %9, %10 : vector<4x4xf32>
    %12 = vector.broadcast %3 : vector<4x1xf32> to vector<4x4xf32>
    %13 = arith.addf %11, %12 : vector<4x4xf32>
    %cst = arith.constant 0.000000e+00 : f32
    %14 = vector.broadcast %cst : f32 to vector<4x4xf32>
    %15 = arith.maximumf %13, %14 : vector<4x4xf32>
    %16 = vector.broadcast %4 : vector<4x1xf32> to vector<4x4xf32>
    %17 = arith.mulf %15, %16 : vector<4x4xf32>
    %18 = vector.broadcast %5 : vector<4x1xf32> to vector<4x4xf32>
    %19 = arith.addf %17, %18 : vector<4x4xf32>
    %cst_6 = arith.constant 0.000000e+00 : f32
    %20 = vector.broadcast %cst_6 : f32 to vector<4x4xf32>
    %21 = arith.maximumf %19, %20 : vector<4x4xf32>
    %22 = vector.broadcast %6 : vector<4x1xf32> to vector<4x4xf32>
    %23 = arith.mulf %21, %22 : vector<4x4xf32>
    %24 = vector.broadcast %7 : vector<4x1xf32> to vector<4x4xf32>
    %25 = arith.addf %23, %24 : vector<4x4xf32>
    %cst_7 = arith.constant 0.000000e+00 : f32
    %26 = vector.broadcast %cst_7 : f32 to vector<4x4xf32>
    %27 = arith.maximumf %25, %26 : vector<4x4xf32>
    %c0_8 = arith.constant 0 : index
    %c0_9 = arith.constant 0 : index
    %28 = vector.load %arg5[%c0_8, %c0_9] : memref<4x256xf32, #tpu.memory_space<vmem>>, vector<4x256xf32>
    %cst_10 = arith.constant dense<0.000000e+00> : vector<4x256xf32>
    %29 = tpu.matmul %27, %28, %cst_10 {dimension_numbers = #tpu.dot_dimension_numbers<[1], [0], [0], [1], [0, 0, 1, 1], [], []>} : vector<4x4xf32>, vector<4x256xf32>, vector<4x256xf32> -> vector<4x256xf32>
    %cst_11 = arith.constant 0.000000e+00 : f32
    %30 = vector.broadcast %cst_11 : f32 to vector<4x256xf32>
    %31 = arith.subf %30, %29 : vector<4x256xf32>
    %32 = math.exp %31 : vector<4x256xf32>
    %cst_12 = arith.constant 1.000000e+00 : f32
    %33 = vector.broadcast %cst_12 : f32 to vector<4x256xf32>
    %34 = arith.addf %33, %32 : vector<4x256xf32>
    %35 = tpu.reciprocal %34 : vector<4x256xf32> -> vector<4x256xf32>
    %c0_13 = arith.constant 0 : index
    %c0_14 = arith.constant 0 : index
    %c0_15 = arith.constant 0 : index
    %c0_16 = arith.constant 0 : index
    %36 = vector.load %arg4[%c0_13, %c0_14, %c0_15, %c0_16] : memref<1x1x4x256xf32, #tpu.memory_space<vmem>>, vector<1x1x4x256xf32>
    %37 = vector.shape_cast %36 : vector<1x1x4x256xf32> to vector<4x256xf32>
    %cst_17 = arith.constant 1.000000e+00 : f32
    %38 = vector.broadcast %cst_17 : f32 to vector<4x256xf32>
    %39 = arith.addf %38, %35 : vector<4x256xf32>
    %40 = arith.mulf %37, %39 : vector<4x256xf32>
    %c0_18 = arith.constant 0 : index
    %c0_19 = arith.constant 0 : index
    %c0_20 = arith.constant 0 : index
    %c0_21 = arith.constant 0 : index
    %41 = vector.load %arg6[%c0_18, %c0_19, %c0_20, %c0_21] : memref<1x1x4x256xf32, #tpu.memory_space<vmem>>, vector<1x1x4x256xf32>
    %42 = vector.shape_cast %41 : vector<1x1x4x256xf32> to vector<4x256xf32>
    %43 = vector.shape_cast %40 : vector<4x256xf32> to vector<1x1x4x256xf32>
    tpu.vector_store %arg6[%c0_18, %c0_19, %c0_20, %c0_21], %43 {strides = array<i32>} : memref<1x1x4x256xf32, #tpu.memory_space<vmem>>, vector<1x1x4x256xf32>,
    return
  }
  func.func @transform_0(%arg0: i32, %arg1: i32) -> (i32, i32, i32) {
    %c0_i32 = arith.constant 0 : i32
    %c0_i32_0 = arith.constant 0 : i32
    %c0_i32_1 = arith.constant 0 : i32
    return %arg1, %c0_i32, %c0_i32_0 : i32, i32, i32
  }
  func.func @transform_1(%arg0: i32, %arg1: i32) -> (i32, i32, i32, i32) {
    %c0_i32 = arith.constant 0 : i32
    %c0_i32_0 = arith.constant 0 : i32
    %c0_i32_1 = arith.constant 0 : i32
    return %arg0, %arg1, %c0_i32, %c0_i32_0 : i32, i32, i32, i32
  }
  func.func @transform_2(%arg0: i32, %arg1: i32) -> (i32, i32, i32, i32) {
    %c0_i32 = arith.constant 0 : i32
    %c0_i32_0 = arith.constant 0 : i32
    %c0_i32_1 = arith.constant 0 : i32
    return %arg0, %arg1, %c0_i32, %c0_i32_0 : i32, i32, i32, i32
  }
  func.func @transform_3(%arg0: i32, %arg1: i32) -> (i32, i32) {
    %c0_i32 = arith.constant 0 : i32
    %c0_i32_0 = arith.constant 0 : i32
    %c0_i32_1 = arith.constant 0 : i32
    return %c0_i32, %c0_i32_0 : i32, i32
  }
  func.func @transform_4(%arg0: i32, %arg1: i32) -> (i32, i32, i32, i32) {
    %c0_i32 = arith.constant 0 : i32
    %c0_i32_0 = arith.constant 0 : i32
    %c0_i32_1 = arith.constant 0 : i32
    return %arg0, %arg1, %c0_i32, %c0_i32_0 : i32, i32, i32, i32
  }
}

</mosaic_0001>

<bundles_post_ra>
// kernel: tpu_custom_call.1
= control target key start
LH: loop header
LB: loop body
LE: loop exit
PB: predicated region body
PF: predicated region fallthrough
CT: control target
= control target key end

     0   :  { %9 = vsyncpa [#allocation3], 0  ;;  %s1174_s0 = inlined_call_operand.hbm [shape: f32[1,4,8], index: 0, kind: input, shape index: {}]   ;;  %s1175_s1 = inlined_call_operand.hbm [shape: f32[2,1,4,4], index: 1, kind: input, shape index: {}]   ;;  %s1176_s2 = inlined_call_operand.hbm [shape: f32[2,1,4,256], index: 2, kind: input, shape index: {}]   ;;  %s1177_s3 = inlined_call_operand.hbm [shape: f32[4,256], index: 3, kind: input, shape index: {}]   ;;  %s1178_s4 = inlined_call_operand.hbm [shape: f32[2,1,4,256], index: 4, kind: output, shape index: {}]  }
   0x1   :  { %10 = vsyncpa [#allocation6], 0 }
   0x2   :  { %12 = vsyncpa [#allocation6 + $0x1], 0 }
   0x3   :  { %13 = vsyncpa [#allocation9], 0 }
   0x4   :  { %14 = vsyncpa [#allocation4], 0 }
   0x5   :  { %16 = vsyncpa [#allocation4 + $0x1], 0  ;;  %s958_s15 = smov 0   ;;  %s960_s16 = smov 0  }
   0x6   :  { %s962_s17 = smov 0   ;;  %s964_s18 = smov 0  }
   0x7   :  { %s966_s19 = smov 0   ;;  %s968_s20 = smov 0  }
   0x8 LB: > { %s34_s21 = sadd.s32 1, %s915_s19  ;;  %s69_s22 = sadd.s32 1, %s907_s17  ;;  %s919_s20 = sphi %s968_s20, %s22_s20   ;;  %s915_s19 = sphi %s966_s19, %s1207_s19   ;;  %s911_s18 = sphi %s964_s18, %s1206_s18   ;;  %s907_s17 = sphi %s962_s17, %s1205_s17   ;;  %s903_s16 = sphi %s960_s16, %s1204_s16   ;;  %s899_s15 = sphi %s958_s15, %s1203_s15  }
   0x9   : > { %p36_p0 = scmp.ge.s32.totalorder %s34_s21, 2  ;;  %p76_p1 = scmp.ne.s32.totalorder %s907_s17, %s903_s16 }
   0xa   : > { %p77_p2 = scmp.eq.s32.totalorder %s919_s20, 0  ;;  %p647_p5 = scmp.lt.s32.totalorder %s919_s20, 2 }
   0xb   : > { %s1209_s21 = smov (%p36_p0, %s34_s21), 0  ;;  %s207_s24 = sand.u32 1, %s919_s20  }
   0xc   : > { %p78_p4 = por %p77_p2, %p76_p1  ;;  %s64_s23 = ssub.s32 %s915_s19, %s1209_s21 }
   0xd   : > { %p67_p6 = scmp.eq.s32.totalorder %s64_s23, 0  ;;  %s209_s25 = sand.u32 1, %s907_s17  }
   0xe   : > { %s593_s26 = sshll.u32 %s915_s19, 6  ;;  %s592_s28 = sshll.u32 %s209_s25, 2 }
   0xf   : > { %s1006_s27 = scalar_select %p67_p6, %s907_s17, %s69_s22  }
  0x10   : > { %s217_s5 = scalar_lea.hbm %s1175_s1, %s593_s26  ;;  %p1011_p7 = pnand %p647_p5, %p78_p4 }
  0x11   : > { %s211_s7 = scalar_lea.vmem [#allocation5], %s592_s28  ;;  %s1015_s9 = sshll.u32 %s209_s25, 3 }
  0x12   : > { %s1186_s6 = scalar_select %p1011_p7, 1, 0 }
  0x13   : > { %s219_s8 = sshll.u32 %s211_s7, 4  ;;  %s1017_s10 = scalar_lea.sflag [#allocation6], %s207_s24  ;;  %s220_s8 = int_to_ptr.vmem [resolvable:$true] %s219_s8 }
  0x14   : > { %p1180_p8 = pneg %p1011_p7  ;;  %s736_s11 = scalar_lea.vmem %s220_s8, 64 }
  0x15   : > { %p737_p9 = scmp.ne.s32.totalorder %s220_s8, %s736_s11  ;;  %s921_s12 = smov [#allocation5]  }
  0x16   : > { %s741_s13 = sshll.u32 %s921_s12, 4  ;;  %s742_s13 = int_to_ptr.vmem [resolvable:$false] %s741_s13 }
  0x17   : > { %p739_p10 = pnand %p737_p9, %p1180_p8  ;;  %s743_s14 = scalar_lea.vmem %s742_s13, 128 }
  0x18   : > { %p744_p12 = scmp.lt.s32.totalorder %s220_s8, %s742_s13  ;;  %p745_p13 = scmp.lt.s32.totalorder %s743_s14, %s736_s11 }
  0x19   : > { %p740_p11 = pneg %p739_p10 }
  0x1a   : > { %p746_p0 = por %p745_p13, %p744_p12 }
  0x1c   : > { %p747_p2 = pnand %p746_p0, %p740_p11 }
  0x1e   : > { %750 = shalt.err (!%p747_p2)
}
  0x1f   : > { %637 = dma.hbm_to_vmem [thread:$0]  (!%p1011_p7), %s217_s5, 64, %s220_s8, %s1017_s10  }
  0x20   : > { %s1028_s22 = sadd.s32 4294967295, %s919_s20   ;;  %s587_s23 = sadd.s32 4294967294, %s919_s20  }
  0x21   : > { %p82_p4 = scmp.ne.s32.totalorder %s903_s16, %s899_s15  ;;  %p1179_p5 = scmp.eq.s32.totalorder %s1028_s22, 0 }
  0x22   : > { %p157_p6 = scmp.eq.s32.totalorder %s1028_s22, 1  ;;  %p163_p9 = scmp.eq.s32.totalorder %s587_s23, 1 }
  0x23   : > { %p1037_p10 = por %p1179_p5, %p82_p4  ;;  %p588_p11 = scmp.ge.s32.totalorder %s919_s20, 1 }
  0x24   : > { %p1045_p12 = por %p157_p6, %p76_p1  ;;  %p1049_p13 = por %p163_p9, %p82_p4 }
  0x25   : > { %s1187_s24 = scalar_select %p1037_p10, 1, 0 }
  0x26   : > { %s1188_s25 = scalar_select %p1045_p12, 1, 0 }
  0x27   : > { %s1189_s26 = scalar_select %p1049_p13, 1, 0 }
  0x28   : > { %p170_p0 = scmp.lt.s32.totalorder %s919_s20, 3  ;;  %s922_s29 = smov [#allocation2]  }
  0x29   : > { %s185_s30 = sshll.u32 %s922_s29, 4  ;;  %s923_s5 = smov [#allocation8]   ;;  %s186_s30 = int_to_ptr.vmem [resolvable:$true] %s185_s30 }
  0x2a   : > { %p1054_p2 = pnand %p588_p11, %p170_p0  ;;  %s196_s7 = sshll.u32 %s923_s5, 4  ;;  %s197_s7 = int_to_ptr.vmem [resolvable:$true] %s196_s7 }
  0x2b   : > { %s611_s8 = sshll.u32 %s915_s19, 7  ;;  %s230_s23 = scalar_lea.vmem [#allocation7], %s1015_s9 }
  0x2c   : > { %s1190_s28 = scalar_select %p1054_p2, 1, 0 }
  0x2d   : > { %p627_p3 = pneg %p1054_p2  ;;  %s1070_s14 = scalar_lea.hbm %s1176_s2, %s611_s8 }
  0x2e   : > { %s240_s29 = sshll.u32 %s230_s23, 4  ;;  %s762_s5 = scalar_lea.vmem %s186_s30, 64  ;;  %s1073_s29 = int_to_ptr.vmem [resolvable:$true] %s240_s29 }
  0x2f   : > { %p1063_p1 = pnand %p627_p3, %p1179_p5  ;;  %p763_p6 = scmp.ne.s32.totalorder %s186_s30, %s762_s5 }
  0x30   : > { %p770_p11 = scmp.lt.s32.totalorder %s186_s30, %s186_s30  ;;  %p771_p0 = scmp.lt.s32.totalorder %s762_s5, %s762_s5 }
  0x31   : > { %p753_p4 = pneg %p1063_p1 }
  0x32   : > { %p772_p5 = por %p771_p0, %p770_p11 }
  0x33   : > { %p765_p3 = pnand %p763_p6, %p753_p4 }
  0x35   : > { %p766_p9 = pneg %p765_p3 }
  0x37   : > { %p773_p8 = pnand %p772_p5, %p766_p9 }
  0x39   : > { %776 = shalt.err (!%p773_p8)
}
  0x3a   : > { %630 = dma.hbm_to_vmem [thread:$0]  (!%p1063_p1), %s1174_s0, 64, %s186_s30, [#allocation3]  }
  0x3b   : > { %s788_s12 = scalar_lea.vmem %s197_s7, 128  ;;  %p796_p6 = scmp.lt.s32.totalorder %s197_s7, %s197_s7 }
  0x3c   : > { %p789_p13 = scmp.ne.s32.totalorder %s197_s7, %s788_s12  ;;  %p797_p3 = scmp.lt.s32.totalorder %s788_s12, %s788_s12 }
  0x3e   : > { %p791_p12 = pnand %p789_p13, %p753_p4  ;;  %p798_p2 = por %p797_p3, %p796_p6 }
  0x40   : > { %p792_p10 = pneg %p791_p12 }
  0x42   : > { %p799_p7 = pnand %p798_p2, %p792_p10 }
  0x44   : > { %802 = shalt.err (!%p799_p7)
}
  0x45   : > { %633 = dma.hbm_to_vmem [thread:$0]  (!%p1063_p1), %s1177_s3, 128, %s197_s7, [#allocation9]  }
  0x46   : > { %s816_s30 = scalar_lea.vmem %s1073_s29, 128  ;;  %p1192_p5 = scmp.ne.s32.totalorder %s1186_s6, 0 }
  0x47   : > { %p817_p8 = scmp.ne.s32.totalorder %s1073_s29, %s816_s30  ;;  %s924_s5 = smov [#allocation7]  }
  0x48   : > { %p1193_p13 = pneg %p1192_p5  ;;  %s821_s8 = sshll.u32 %s924_s5, 4  ;;  %s822_s8 = int_to_ptr.vmem [resolvable:$false] %s821_s8 }
  0x49   : > { %s823_s9 = scalar_lea.vmem %s822_s8, 256  ;;  %p824_p7 = scmp.lt.s32.totalorder %s1073_s29, %s822_s8 }
  0x4a   : > { %p819_p12 = pnand %p817_p8, %p1193_p13  ;;  %p825_p10 = scmp.lt.s32.totalorder %s823_s9, %s816_s30 }
  0x4c   : > { %p820_p4 = pneg %p819_p12  ;;  %p826_p2 = por %p825_p10, %p824_p7 }
  0x4e   : > { %p827_p9 = pnand %p826_p2, %p820_p4 }
  0x50   : > { %830 = shalt.err (!%p827_p9)
}
  0x51   : > { %640 = dma.hbm_to_vmem [thread:$0]  (!%p1192_p5), %s1070_s14, 128, %s1073_s29, %s1017_s10  }
  0x52   : > { %p1194_p1 = scmp.ne.s32.totalorder %s1190_s28, 0 }
  0x53   : > { %p1195_p11 = scmp.eq.s32.totalorder (!%p1194_p1), %s1028_s22, 0 }
  0x54   : > { %249 = sbr.rel (%p1194_p1) target bundleno = 493 (0x1ed), region = 36 }
  0x59   : > { %882 = dma.done.wait (%p1195_p11), [#allocation3], 64   ;;  %p1196_p0 = pmov %p1195_p11 }
  0x5a   : > { %s255_s7 = sand.u32 1, %s1028_s22   ;;  %s1112_s11 = sand.u32 1, %s903_s16  }
  0x5b   : > { %884 = vsyncadd (%p1196_p0), [#allocation3], 4294967232  ;;  %s599_s6 = sshll.u32 %s1112_s11, 2  ;;  %s256_s12 = scalar_lea.sflag [#allocation6], %s255_s7 }
  0x5c   : > { %s1115_s13 = scalar_lea.vmem [#allocation5], %s599_s6  ;;  %p1197_p6 = scmp.ne.s32.totalorder %s1187_s24, 0 }
  0x5e   : > { %886 = dma.done.wait (%p1197_p6), %s256_s12, 192  }
  0x5f   : > { %888 = vsyncadd (%p1197_p6), %s256_s12, 4294967104  ;;  %s600_s10 = sshll.u32 %s1112_s11, 3  ;;  %p1198_p3 = pmov %p1196_p0 }
  0x60   : > { %s1124_s28 = scalar_lea.vmem [#allocation7], %s600_s10 }
  0x61   : > { %890 = dma.done.wait (%p1198_p3), [#allocation9], 128   ;;  %p1199_p8 = pmov %p1196_p0 }
  0x62   : > { %v925_v0 = vmov 0   ;;  %v926_v1 = vmov 2   ;;  %v302_v2 = vld [vmem:[#allocation2] sm:$0xf]  ;;  %v927_v3 = vmov 1   ;;  %v928_v4 = vmov 3  }
  0x63   : > { %892 = vsyncadd (%p1199_p8), [#allocation9], 4294967168  ;;  %708 = vset.pattern.permute.xlu0 %v925_v0  ;;  %710 = vset.pattern.permute.xlu1 %v926_v1  ;;  %v929_v5 = vmov 4   ;;  %v930_v6 = vmov 5   ;;  %v338_v7 = vld [vmem:[#allocation8] sm:$0xff]  ;;  %vm345_vm0 = vcmask 1043456  }
  0x64   : > { %306 = vperm.xlu0 %708, %v302_v2   ;;  %317 = vperm.xlu1 %710, %v302_v2   ;;  %v340_v8 = vcombine.high %v338_v7, %v338_v7  ;;  %v931_v9 = vmov 0.0   ;;  %v303_v11 = vld [vmem:[%s1115_s13] sm:$0xf]  ;;  %vm341_vm1 = vcmask 31744   ;;  %v431_v40 = vld [vmem:[%s1124_s28] sm:$0xff]  ;;  %s612_s22 = sshll.u32 %s911_s18, 7 }
  0x65   : > { %414 = vmatprep.mubr.f32.mxu0 %v931_v9  ;;  %s301_s24 = scalar_lea.vmem [#allocation10], %s600_s10  ;;  %s455_s30 = scalar_lea.hbm %s1178_s4, %s612_s22 }
  0x66   : > { %603 = vmatprep.subr.msk.mxu0 %vm345_vm0, %v340_v8  ;;  %s457_s14 = sshll.u32 %s301_s24, 4  ;;  %s441_s5 = scalar_lea.sflag [#allocation4], %s1112_s11  ;;  %s458_s14 = int_to_ptr.vmem [resolvable:$true] %s457_s14 }
  0x67   : > { %604 = vmatpush1.msk.msra.mxu0 %vm345_vm0, %v338_v7  ;;  %s831_s8 = scalar_lea.vmem %s458_s14, 128  ;;  %p1200_p13 = scmp.ne.s32.totalorder %s1188_s25, 0 }
  0x68   : > { %709 = vset.pattern.permute.xlu0 %v927_v3  ;;  %711 = vset.pattern.permute.xlu1 %v928_v4  ;;  %p832_p5 = scmp.ne.s32.totalorder %s458_s14, %s831_s8  ;;  %s932_s9 = smov [#allocation10]  }
  0x69   : > { %311 = vperm.xlu0 %709, %v302_v2   ;;  %322 = vperm.xlu1 %711, %v302_v2   ;;  %s835_s7 = sshll.u32 %s932_s9, 4  ;;  %s836_s7 = int_to_ptr.vmem [resolvable:$false] %s835_s7 }
  0x6a   : > { %p833_p12 = pnand %p832_p5, %p1200_p13  ;;  %s837_s18 = scalar_lea.vmem %s836_s7, 256 }
  0x6b   : > { %p838_p7 = scmp.lt.s32.totalorder %s458_s14, %s836_s7  ;;  %p839_p10 = scmp.lt.s32.totalorder %s837_s18, %s831_s8 }
  0x6c   : > { %p834_p4 = pneg %p833_p12 }
  0x6d   : > { %712 = vset.pattern.permute.xlu1 %v929_v5  ;;  %713 = vset.pattern.permute.xlu0 %v930_v6  ;;  %p840_p2 = por %p839_p10, %p838_p7 }
  0x6e   : > { %328 = vperm.xlu1 %712, %v302_v2   ;;  %333 = vperm.xlu0 %713, %v302_v2  }
  0x6f   : > { %p841_p9 = pnand %p840_p2, %p834_p4 }
  0xdf   : > { %v307_v10 = vpop.permute.xlu0 %306  ;;  %v318_v12 = vpop.permute.xlu1 %317 }
  0xe0   : > { %v309_v13 = vmul.f32 %v307_v10, %v303_v11 }
  0xe4   : > { %v312_v14 = vpop.permute.xlu0 %311  ;;  %v323_v16 = vpop.permute.xlu1 %322 }
  0xe5   : > { %v314_v15 = vadd.f32 %v312_v14, %v309_v13 }
  0xe7   : > { %v315_v17 = vmax.f32 %v314_v15, 0.0 }
  0xe9   : > { %v320_v18 = vmul.f32 %v318_v12, %v315_v17  ;;  %v329_v20 = vpop.permute.xlu1 %328  ;;  %v334_v22 = vpop.permute.xlu0 %333 }
  0xeb   : > { %v325_v19 = vadd.f32 %v323_v16, %v320_v18 }
  0xed   : > { %v326_v21 = vmax.f32 %v325_v19, 0.0 }
  0xef   : > { %v331_v23 = vmul.f32 %v329_v20, %v326_v21 }
  0xf1   : > { %v336_v24 = vadd.f32 %v334_v22, %v331_v23 }
  0xf3   : > { %v337_v25 = vmax.f32 %v336_v24, 0.0 }
  0xf5   : > { %605 = vmatmul.mubr.msk.f32.vlgmr.msra.gmra.mxu0 %vm341_vm1, %v337_v25 }
 0x1b5   : > { %v416_v26 = vpop.f32.mrf.mxu0 }
 0x1b6   : > { %v421_v27 = vsub.f32 0.0, %v416_v26 }
 0x1b7   : > { %v418_v28 = vpop.f32.mrf.mxu0 }
 0x1b8   : > { %v423_v29 = vmul.f32 1.442695, %v421_v27  ;;  %v422_v30 = vsub.f32 0.0, %v418_v28 }
 0x1ba   : > { %715 = vpow2.f32 %v423_v29  ;;  %v425_v31 = vmul.f32 1.442695, %v422_v30 }
 0x1bc   : > { %717 = vpow2.f32 %v425_v31 }
 0x1c7   : > { %v716_v32 = vpop.eup %715 }
 0x1c8   : > { %v427_v33 = vadd.f32 1.0, %v716_v32 }
 0x1c9   : > { %v718_v34 = vpop.eup %717 }
 0x1ca   : > { %719 = vrcp.f32 %v427_v33  ;;  %v428_v35 = vadd.f32 1.0, %v718_v34 }
 0x1cc   : > { %721 = vrcp.f32 %v428_v35 }
 0x1d7   : > { %v720_v36 = vpop.eup %719 }
 0x1d8   : > { %v432_v38 = vadd.f32 1.0, %v720_v36 }
 0x1d9   : > { %v722_v37 = vpop.eup %721 }
 0x1da   : > { %v433_v39 = vadd.f32 1.0, %v722_v37 }
 0x1dc   : > { %v436_v41 = vcombine.low %v432_v38, %v433_v39 }
 0x1de   : > { %v438_v42 = vmul.f32 %v436_v41, %v431_v40 }
 0x1e0   : > { %439 = vst [vmem:[%s301_s24] sm:$0xff] %v438_v42 }
 0x1e1   : > { %844 = shalt.err (!%p841_p9)
}
 0x1e2   : > { %s845_s6 = scalar_lea.hbm %s455_s30, 128  ;;  %s849_s13 = scalar_lea.hbm %s1178_s4, 256 }
 0x1e3   : > { %p846_p1 = scmp.ne.s32.totalorder %s455_s30, %s845_s6  ;;  %p850_p6 = scmp.lt.s32.totalorder %s455_s30, %s1178_s4 }
 0x1e4   : > { %p851_p3 = scmp.lt.s32.totalorder %s849_s13, %s845_s6 }
 0x1e5   : > { %p847_p11 = pnand %p846_p1, %p1200_p13 }
 0x1e6   : > { %p852_p8 = por %p851_p3, %p850_p6 }
 0x1e7   : > { %p848_p0 = pneg %p847_p11 }
 0x1e9   : > { %p853_p5 = pnand %p852_p8, %p848_p0 }
 0x1eb   : > { %856 = shalt.err (!%p853_p5)
}
 0x1ec   : > { %625 = dma.vmem_to_hbm [thread:$0]  (%p1200_p13), %s458_s14, 128, %s455_s30, %s441_s5  }
 0x1ed PF: > { %s469_s22 = sand.u32 1, %s899_s15   ;;  %p1201_p12 = scmp.ne.s32.totalorder %s1189_s26, 0 }
 0x1ee   : > { %p1202_p4 = scmp.ge.s32.totalorder %s919_s20, 2  ;;  %s470_s24 = scalar_lea.sflag [#allocation4], %s469_s22 }
 0x1f0   : > { %p642_p7 = pnand %p1202_p4, %p1201_p12 }
 0x1f2   : > { %p643_p10 = pneg %p642_p7 }
 0x1f4   : > { %894 = dma.done.wait (%p643_p10), %s470_s24, 128  }
 0x1f5   : > { %896 = vsyncadd (%p643_p10), %s470_s24, 4294967168  ;;  %s22_s20 = sadd.s32 1, %s919_s20   ;;  %s1203_s15 = smov %s903_s16 }
 0x1f6   : > { %p19_p2 = scmp.ge.s32.totalorder %s22_s20, 4   ;;  %s1204_s16 = smov %s907_s17 }
 0x1f7   : > { %s1205_s17 = smov %s1006_s27  ;;  %s1206_s18 = smov %s915_s19 }
 0x1f8   : > { %s1207_s19 = smov %s1209_s21  ;;  %21 = sbr.rel (!%p19_p2) target bundleno = 8 (0x8), region = 102 }
 0x1fd   :  { %475 = vsyncpa [#allocation3], 1 }
 0x1fe   :  { %477 = vsyncpa [#allocation3 + $0x1], 1 }
 0x1ff   :  { %478 = vsyncpa [#allocation6], 1 }
 0x200   :  { %480 = vsyncpa [#allocation6 + $0x1], 1 }
 0x201   :  { %481 = vsyncpa [#allocation9], 1 }
 0x202   :  { %482 = vsyncpa [#allocation4], 1 }
 0x203   :  { %484 = vsyncpa [#allocation4 + $0x1], 1 }

</bundles_post_ra>
